<compile_context>
chip_gen: v6e
topology: v6e:2x2x1
jax: 0.10.0
libtpu: 0.0.40
codegen_flags: <defaults>
</compile_context>

<pallas_src>
import jax
import jax.numpy as jnp
from jax.experimental import pallas as pl
from jax.experimental.pallas import tpu as pltpu

_LANE = 128       # N (output-feature) dims padded to the 128-lane axis
_SUBLANE = 16     # bf16 sublane packing for the x tile (also covers f32's 8)
_MAX_TB = 512     # batch-tile cap


def _round_up(n, m):
    return (n + m - 1) // m * m


def _vmem_limit_bytes():
    """Per-generation VMEM limit: ~3/4 of physical VMEM, capped at 100 MiB."""
    cap = 64 * 1024 * 1024                       # conservative default (v7x physical)
    try:
        info = pltpu.get_tpu_info()
        cap = int(getattr(info, "vmem_capacity_bytes", cap))
    except Exception:
        pass
    return min(cap * 3 // 4, 100 * 1024 * 1024)  # 48 MiB on v7x, 96 MiB on v5e/v6e


def _siamese_mlp_kernel(x_ref, w1_ref, b1_ref, w2_ref, b2_ref, o_ref):
    """One batch tile of the fused 2-layer sigmoid MLP.

    x and the weights arrive as bf16 (MXU fast path); accumulation and the
    elementwise sigmoid chain are f32.
    """
    h = jnp.dot(x_ref[...], w1_ref[...], preferred_element_type=jnp.float32)
    h = jax.nn.sigmoid(h + b1_ref[...])                        # (1, HID_P) broadcasts
    o = jnp.dot(h.astype(jnp.bfloat16), w2_ref[...],
                preferred_element_type=jnp.float32)
    o_ref[...] = jax.nn.sigmoid(o + b2_ref[...]).astype(o_ref.dtype)


def forward_once(x, params):
    """Run the shared MLP on a [batch, input_dim] array via one pallas_call."""
    w1, b1, w2, b2 = params["w1"], params["b1"], params["w2"], params["b2"]
    batch, in_dim = x.shape
    hid_dim = w1.shape[1]
    out_dim = w2.shape[1]

    # Only the N dims are padded (to 128 lanes); zero padding is exact (padded
    # hidden columns hit zero rows of W2 -> no contamination; padded output
    # columns are sliced off).  K (=in_dim) and batch stay unpadded in HBM.
    hid_p = _round_up(hid_dim, _LANE)
    out_p = _round_up(out_dim, _LANE)

    x_bf = x.astype(jnp.bfloat16)                # fuses with the producer concat
    w1_p = jnp.pad(w1.astype(jnp.bfloat16), ((0, 0), (0, hid_p - hid_dim)))
    b1_p = jnp.pad(b1, ((0, 0), (0, hid_p - hid_dim)))
    w2_p = jnp.pad(w2.astype(jnp.bfloat16),
                   ((0, hid_p - hid_dim), (0, out_p - out_dim)))
    b2_p = jnp.pad(b2, ((0, 0), (0, out_p - out_dim)))

    vmem_limit = _vmem_limit_bytes()

    # Resident (single-buffered) weight/bias bytes.
    weight_bytes = (in_dim * hid_p + hid_p * out_p) * 2 + (hid_p + out_p) * 4
    # Per-batch-row VMEM: double-buffered x/out tiles + f32 h, bf16 h, f32 o.
    row_bytes = 2 * in_dim * 2 + 2 * out_p * 4 + hid_p * (4 + 2) + out_p * 4
    budget = vmem_limit - weight_bytes - (4 << 20)             # 4 MiB headroom
    tb_vmem = max(_SUBLANE, budget // row_bytes // _SUBLANE * _SUBLANE)

    if batch <= 2 * _SUBLANE:
        tb = batch                               # one full-extent tile (exempt)
    else:
        # Aim for >=4 grid steps so both v7x TensorCores get work, but never
        # exceed the VMEM budget or the 512-row cap.
        tb_split = _round_up(-(-batch // 4), _SUBLANE)
        tb = max(_SUBLANE, min(_MAX_TB, tb_vmem, tb_split))
    grid = (pl.cdiv(batch, tb),)                 # ragged final block is masked

    cost = pl.CostEstimate(
        flops=2 * batch * (in_dim * hid_p + hid_p * out_p),
        transcendentals=batch * (hid_p + out_p),               # sigmoid -> EUP exp
        bytes_accessed=batch * in_dim * 2 + weight_bytes + batch * out_p * 4,
    )

    resident = pl.Buffered(1)    # constant index_map -> single VMEM buffer

    out_full = pl.pallas_call(
        _siamese_mlp_kernel,
        out_shape=jax.ShapeDtypeStruct((batch, out_p), jnp.float32),
        grid=grid,
        in_specs=[
            pl.BlockSpec((tb, in_dim), lambda i: (i, 0)),               # x: pipelined
            pl.BlockSpec((in_dim, hid_p), lambda i: (0, 0), pipeline_mode=resident),
            pl.BlockSpec((1, hid_p), lambda i: (0, 0), pipeline_mode=resident),
            pl.BlockSpec((hid_p, out_p), lambda i: (0, 0), pipeline_mode=resident),
            pl.BlockSpec((1, out_p), lambda i: (0, 0), pipeline_mode=resident),
        ],
        out_specs=pl.BlockSpec((tb, out_p), lambda i: (i, 0)),
        compiler_params=pltpu.CompilerParams(
            dimension_semantics=("parallel",),
            vmem_limit_bytes=vmem_limit,
        ),
        cost_estimate=cost,
    )(x_bf, w1_p, b1_p, w2_p, b2_p)

    # Batch rows are exact; only the small padded output columns are dropped.
    return out_full[:, :out_dim]


def forward(x1, x2, params):
    """Siamese forward with shared weights, fused into a single pallas_call."""
    n1 = x1.shape[0]
    # concat + bf16 cast fuse into one HBM pass; weights are DMA'd once.
    x = jnp.concatenate([x1, x2], axis=0).astype(jnp.bfloat16)
    out = forward_once(x, params)
    return out[:n1], out[n1:]


def init_params(key, input_dim, hidden_dim, output_dim):
    """Deterministic synthetic weights (nn.Linear shapes, pre-transposed to [in, out])."""
    k1, k2, k3, k4 = jax.random.split(key, 4)
    s1 = 1.0 / jnp.sqrt(input_dim)
    s2 = 1.0 / jnp.sqrt(hidden_dim)
    return {
        "w1": jax.random.uniform(k1, (input_dim, hidden_dim), jnp.float32, -s1, s1),
        "b1": jax.random.uniform(k2, (1, hidden_dim), jnp.float32, -s1, s1),
        "w2": jax.random.uniform(k3, (hidden_dim, output_dim), jnp.float32, -s2, s2),
        "b2": jax.random.uniform(k4, (1, output_dim), jnp.float32, -s2, s2),
    }


if __name__ == "__main__":
    key = jax.random.PRNGKey(0)
    kx1, kx2, kx3, kx4, kp = jax.random.split(key, 5)

    batch, input_dim, hidden_dim, output_dim = 8, 40, 64, 32
    x1 = jax.random.normal(kx1, (batch, input_dim), jnp.float32)
    x2 = jax.random.normal(kx2, (batch, input_dim), jnp.float32)
    params = init_params(kp, input_dim, hidden_dim, output_dim)

    e1, e2 = forward(x1, x2, params)
    jax.block_until_ready((e1, e2))
    assert e1.shape == (batch, output_dim) and e2.shape == (batch, output_dim)

    # Pure-JAX reference mirroring the kernel's bf16 matmul / f32 accumulate.
    w1b = params["w1"].astype(jnp.bfloat16)
    w2b = params["w2"].astype(jnp.bfloat16)

    def ref_mirror(x):
        h = jax.nn.sigmoid(
            jnp.dot(x.astype(jnp.bfloat16), w1b,
                    preferred_element_type=jnp.float32) + params["b1"])
        return jax.nn.sigmoid(
            jnp.dot(h.astype(jnp.bfloat16), w2b,
                    preferred_element_type=jnp.float32) + params["b2"])

    # Full-precision reference (semantic check; loose tol for bf16 weights).
    def ref_f32(x):
        h = jax.nn.sigmoid(x @ params["w1"] + params["b1"])
        return jax.nn.sigmoid(h @ params["w2"] + params["b2"])

    assert jnp.allclose(e1, ref_mirror(x1), atol=2e-4)
    assert jnp.allclose(e2, ref_mirror(x2), atol=2e-4)
    assert jnp.allclose(e1, ref_f32(x1), atol=2e-2)
    assert jnp.allclose(e2, ref_f32(x2), atol=2e-2)

    # Multi-tile path: grid > 1 with a ragged final batch block.
    big = 40
    xb1 = jax.random.normal(kx3, (big, input_dim), jnp.float32)
    xb2 = jax.random.normal(kx4, (big, input_dim), jnp.float32)
    f1, f2 = forward(xb1, xb2, params)
    jax.block_until_ready((f1, f2))
    assert f1.shape == (big, output_dim) and f2.shape == (big, output_dim)
    assert jnp.allclose(f1, ref_mirror(xb1), atol=2e-4)
    assert jnp.allclose(f2, ref_mirror(xb2), atol=2e-4)

    print("KERNEL_OK")
</pallas_src>

<mosaic_0001>
module attributes {stable_mosaic.version = 11 : i64} {
  func.func @_siamese_mlp_kernel(%arg0: i32, %arg1: memref<16x40xbf16, #tpu.memory_space<vmem>>, %arg2: memref<40x128xbf16, #tpu.memory_space<vmem>>, %arg3: memref<1x128xf32, #tpu.memory_space<vmem>>, %arg4: memref<128x128xbf16, #tpu.memory_space<vmem>>, %arg5: memref<1x128xf32, #tpu.memory_space<vmem>>, %arg6: memref<16x128xf32, #tpu.memory_space<vmem>>) attributes {dimension_semantics = [#tpu.dimension_semantics<parallel>], iteration_bounds = array<i64: 1>, scalar_prefetch = 0 : i64, scratch_operands = 0 : i64, tpu.core_type = #tpu.core_type<tc>, window_params = [{transform_indices = @transform_0, window_bounds = array<i64: 16, 40>}, {pipeline_mode = #tpu.pipeline_mode<synchronous>, transform_indices = @transform_1, window_bounds = array<i64: 40, 128>}, {pipeline_mode = #tpu.pipeline_mode<synchronous>, transform_indices = @transform_2, window_bounds = array<i64: 1, 128>}, {pipeline_mode = #tpu.pipeline_mode<synchronous>, transform_indices = @transform_3, window_bounds = array<i64: 128, 128>}, {pipeline_mode = #tpu.pipeline_mode<synchronous>, transform_indices = @transform_4, window_bounds = array<i64: 1, 128>}, {transform_indices = @transform_5, window_bounds = array<i64: 16, 128>}]} {
    %c0 = arith.constant 0 : index
    %c0_0 = arith.constant 0 : index
    %0 = vector.load %arg1[%c0, %c0_0] : memref<16x40xbf16, #tpu.memory_space<vmem>>, vector<16x40xbf16>
    %c0_1 = arith.constant 0 : index
    %c0_2 = arith.constant 0 : index
    %1 = vector.load %arg2[%c0_1, %c0_2] : memref<40x128xbf16, #tpu.memory_space<vmem>>, vector<40x128xbf16>
    %cst = arith.constant dense<0.000000e+00> : vector<16x128xf32>
    %2 = tpu.matmul %0, %1, %cst {dimension_numbers = #tpu.dot_dimension_numbers<[1], [0], [0], [1], [0, 0, 1, 1], [], []>} : vector<16x40xbf16>, vector<40x128xbf16>, vector<16x128xf32> -> vector<16x128xf32>
    %c0_3 = arith.constant 0 : index
    %c0_4 = arith.constant 0 : index
    %3 = vector.load %arg3[%c0_3, %c0_4] : memref<1x128xf32, #tpu.memory_space<vmem>>, vector<1x128xf32>
    %4 = vector.broadcast %3 : vector<1x128xf32> to vector<16x128xf32>
    %5 = arith.addf %2, %4 : vector<16x128xf32>
    %6 = arith.negf %5 : vector<16x128xf32>
    %7 = math.exp %6 : vector<16x128xf32>
    %cst_5 = arith.constant 1.000000e+00 : f32
    %8 = vector.broadcast %cst_5 : f32 to vector<16x128xf32>
    %9 = arith.addf %8, %7 : vector<16x128xf32>
    %10 = arith.divf %8, %9 : vector<16x128xf32>
    %11 = arith.truncf %10 : vector<16x128xf32> to vector<16x128xbf16>
    %c0_6 = arith.constant 0 : index
    %c0_7 = arith.constant 0 : index
    %12 = vector.load %arg4[%c0_6, %c0_7] : memref<128x128xbf16, #tpu.memory_space<vmem>>, vector<128x128xbf16>
    %cst_8 = arith.constant dense<0.000000e+00> : vector<16x128xf32>
    %13 = tpu.matmul %11, %12, %cst_8 {dimension_numbers = #tpu.dot_dimension_numbers<[1], [0], [0], [1], [0, 0, 1, 1], [], []>} : vector<16x128xbf16>, vector<128x128xbf16>, vector<16x128xf32> -> vector<16x128xf32>
    %c0_9 = arith.constant 0 : index
    %c0_10 = arith.constant 0 : index
    %14 = vector.load %arg5[%c0_9, %c0_10] : memref<1x128xf32, #tpu.memory_space<vmem>>, vector<1x128xf32>
    %15 = vector.broadcast %14 : vector<1x128xf32> to vector<16x128xf32>
    %16 = arith.addf %13, %15 : vector<16x128xf32>
    %17 = arith.negf %16 : vector<16x128xf32>
    %18 = math.exp %17 : vector<16x128xf32>
    %cst_11 = arith.constant 1.000000e+00 : f32
    %19 = vector.broadcast %cst_11 : f32 to vector<16x128xf32>
    %20 = arith.addf %19, %18 : vector<16x128xf32>
    %21 = arith.divf %19, %20 : vector<16x128xf32>
    %c0_12 = arith.constant 0 : index
    %c0_13 = arith.constant 0 : index
    %22 = vector.load %arg6[%c0_12, %c0_13] : memref<16x128xf32, #tpu.memory_space<vmem>>, vector<16x128xf32>
    tpu.vector_store %arg6[%c0_12, %c0_13], %21 {strides = array<i32>} : memref<16x128xf32, #tpu.memory_space<vmem>>, vector<16x128xf32>,
    return
  }
  func.func @transform_0(%arg0: i32) -> (i32, i32) {
    %c0_i32 = arith.constant 0 : i32
    %c0_i32_0 = arith.constant 0 : i32
    return %arg0, %c0_i32 : i32, i32
  }
  func.func @transform_1(%arg0: i32) -> (i32, i32) {
    %c0_i32 = arith.constant 0 : i32
    %c0_i32_0 = arith.constant 0 : i32
    %c0_i32_1 = arith.constant 0 : i32
    return %c0_i32, %c0_i32_0 : i32, i32
  }
  func.func @transform_2(%arg0: i32) -> (i32, i32) {
    %c0_i32 = arith.constant 0 : i32
    %c0_i32_0 = arith.constant 0 : i32
    %c0_i32_1 = arith.constant 0 : i32
    return %c0_i32, %c0_i32_0 : i32, i32
  }
  func.func @transform_3(%arg0: i32) -> (i32, i32) {
    %c0_i32 = arith.constant 0 : i32
    %c0_i32_0 = arith.constant 0 : i32
    %c0_i32_1 = arith.constant 0 : i32
    return %c0_i32, %c0_i32_0 : i32, i32
  }
  func.func @transform_4(%arg0: i32) -> (i32, i32) {
    %c0_i32 = arith.constant 0 : i32
    %c0_i32_0 = arith.constant 0 : i32
    %c0_i32_1 = arith.constant 0 : i32
    return %c0_i32, %c0_i32_0 : i32, i32
  }
  func.func @transform_5(%arg0: i32) -> (i32, i32) {
    %c0_i32 = arith.constant 0 : i32
    %c0_i32_0 = arith.constant 0 : i32
    return %arg0, %c0_i32 : i32, i32
  }
}

</mosaic_0001>

<bundles_post_ra>
// kernel: tpu_custom_call.1
= control target key start
LH: loop header
LB: loop body
LE: loop exit
PB: predicated region body
PF: predicated region fallthrough
CT: control target
= control target key end

     0   :  { %10 = vsyncpa [#allocation3], 0  ;;  %s547_s0 = inlined_call_operand.hbm [shape: bf16[16,40], index: 0, kind: input, shape index: {}]   ;;  %s548_s1 = inlined_call_operand.hbm [shape: bf16[40,128], index: 1, kind: input, shape index: {}]   ;;  %s549_s2 = inlined_call_operand.vmem [shape: f32[1,128], index: 2, kind: input, shape index: {}]   ;;  %s550_s3 = inlined_call_operand.hbm [shape: bf16[128,128], index: 3, kind: input, shape index: {}]   ;;  %s551_s4 = inlined_call_operand.vmem [shape: f32[1,128], index: 4, kind: input, shape index: {}]   ;;  %s552_s5 = inlined_call_operand.hbm [shape: f32[16,128], index: 5, kind: output, shape index: {}]  }
   0x1   :  { %11 = vsyncpa [#allocation6], 0 }
   0x2   :  { %12 = vsyncpa [#allocation4], 0  ;;  %s489_s18 = smov [#allocation5]   ;;  %s490_s20 = smov [#allocation2]  }
   0x3   :  { %s30_s19 = sshll.u32 %s489_s18, 4  ;;  %s18_s21 = sshll.u32 %s490_s20, 4  ;;  %s31_s19 = int_to_ptr.vmem [resolvable:$true] %s30_s19  ;;  %s19_s21 = int_to_ptr.vmem [resolvable:$true] %s18_s21 }
   0x4   :  { %s411_s22 = scalar_lea.vmem %s31_s19, 320  ;;  %p416_p1 = scmp.lt.s32.totalorder %s31_s19, %s31_s19 }
   0x5   :  { %p412_p0 = scmp.ne.s32.totalorder %s31_s19, %s411_s22  ;;  %p417_p2 = scmp.lt.s32.totalorder %s411_s22, %s411_s22 }
   0x7   :  { %p418_p3 = por %p417_p2, %p416_p1 }
   0x9   :  { %p419_p4 = pnand %p418_p3, %p412_p0 }
   0xb   :  { %422 = shalt.err (!%p419_p4)
}
   0xc   :  { %s491_s23 = smov 64   ;;  %s492_s24 = smov 4  }
   0xd   :  { %36 = dma.hbm_to_vmem [thread:$0]  %s548_s1, 320, %s31_s19, [#allocation6], %s491_s23, %s491_s23, %s492_s24  }
   0xe   :  { %s431_s27 = scalar_lea.vmem %s19_s21, 128  ;;  %p436_p6 = scmp.lt.s32.totalorder %s19_s21, %s19_s21 }
   0xf   :  { %p432_p5 = scmp.ne.s32.totalorder %s19_s21, %s431_s27  ;;  %p437_p7 = scmp.lt.s32.totalorder %s431_s27, %s431_s27 }
  0x11   :  { %p438_p8 = por %p437_p7, %p436_p6 }
  0x13   :  { %p439_p9 = pnand %p438_p8, %p432_p5 }
  0x15   :  { %442 = shalt.err (!%p439_p9)
}
  0x16   :  { %24 = dma.hbm_to_vmem [thread:$0]  %s547_s0, 128, %s19_s21, [#allocation3], %s491_s23, %s491_s23, %s492_s24  }
  0x17   :  { %s493_s30 = smov [#allocation7]  }
  0x18   :  { %s44_s6 = sshll.u32 %s493_s30, 4  ;;  %s45_s6 = int_to_ptr.vmem [resolvable:$true] %s44_s6 }
  0x19   :  { %s451_s7 = scalar_lea.vmem %s45_s6, 1024  ;;  %p456_p11 = scmp.lt.s32.totalorder %s45_s6, %s45_s6 }
  0x1a   :  { %p452_p10 = scmp.ne.s32.totalorder %s45_s6, %s451_s7  ;;  %p457_p12 = scmp.lt.s32.totalorder %s451_s7, %s451_s7 }
  0x1c   :  { %p458_p13 = por %p457_p12, %p456_p11 }
  0x1e   :  { %p459_p0 = pnand %p458_p13, %p452_p10 }
  0x20   :  { %462 = shalt.err (!%p459_p0)
}
  0x21   :  { %50 = dma.hbm_to_vmem [thread:$0]  %s550_s3, 1024, %s45_s6, [#allocation6], %s491_s23, %s491_s23, %s492_s24  }
  0x22   :  { %483 = dma.done.wait [#allocation3], 128  }
  0x23   :  { %484 = vsyncadd [#allocation3], 4294967168 }
  0x24   :  { %485 = dma.done.wait [#allocation6], 1344  }
  0x25   :  { %486 = vsyncadd [#allocation6], 4294965952  ;;  %v494_v0 = vmov 0.0   ;;  %vm495_vm0 = vmmov 0   ;;  %vm101_vm1 = vcmask 1043456   ;;  %v376_v3 = vld [vmem:[#allocation5 + $0x8] sm:$0xff]  }
  0x26   :  { %335 = vmatprep.subr.bf16.mxu0 %v494_v0  ;;  %341 = vmatprep.mubr.msk.bf16.mxu0 %vm495_vm0, %v494_v0  ;;  %v375_v1 = vld [vmem:[#allocation5 + $0x10] ss:$0 sps:$4 sm:$0xff]   ;;  %v377_v4 = vld [vmem:[#allocation5] sm:$0xff]   ;;  %v378_v5 = vld [vmem:[#allocation2] sm:$0xff]   ;;  %vm97_vm2 = vcmask 326656   ;;  %s496_s10 = smov [#allocation8]  }
  0x27   :  { %345 = vmatprep.subr.bf16.mxu1 %v494_v0  ;;  %361 = vmatprep.mubr.msk.bf16.mxu1 %vm495_vm0, %v494_v0  ;;  %v103_v2 = vsel %vm101_vm1, %v375_v1, 0  ;;  %v379_v6 = vld [vmem:[#allocation7 + $0x38] sm:$0xff]   ;;  %v380_v7 = vld [vmem:[#allocation7 + $0x30] sm:$0xff]   ;;  %v381_v8 = vld [vmem:[#allocation7 + $0x28] sm:$0xff]   ;;  %s290_s11 = sshll.u32 %s496_s10, 4  ;;  %s291_s11 = int_to_ptr.vmem [resolvable:$true] %s290_s11 }
  0x28   :  { %336 = vmatpush3.bf16.msra.mxu0 %v103_v2  ;;  %346 = vmatpush3.bf16.msra.mxu1 %v379_v6  ;;  %v382_v9 = vld [vmem:[#allocation7 + $0x20] sm:$0xff]   ;;  %v383_v10 = vld [vmem:[#allocation7 + $0x18] sm:$0xff]   ;;  %v384_v11 = vld [vmem:[#allocation7 + $0x10] sm:$0xff]   ;;  %p468_p2 = scmp.lt.s32.totalorder %s291_s11, %s291_s11 }
  0x29   :  { %337 = vmatprep.subr.bf16.mxu0 %v494_v0  ;;  %347 = vmatprep.subr.bf16.mxu1 %v494_v0  ;;  %v385_v12 = vld [vmem:[#allocation7 + $0x8] sm:$0xff]   ;;  %v386_v13 = vld [vmem:[#allocation7] sm:$0xff]  }
  0x2a   :  { %v303_v14 = vld [vmem:[%s549_s2] ss:$0 sm:$0xff] }
  0x2b   :  { %v311_v30 = vld [vmem:[%s551_s4] ss:$0 sm:$0xff]  ;;  %s463_s4 = scalar_lea.vmem %s291_s11, 256 }
  0x2c   :  { %338 = vmatpush3.bf16.msra.mxu0 %v376_v3  ;;  %348 = vmatpush3.bf16.msra.mxu1 %v380_v7  ;;  %p464_p1 = scmp.ne.s32.totalorder %s291_s11, %s463_s4  ;;  %p469_p3 = scmp.lt.s32.totalorder %s463_s4, %s463_s4 }
  0x2d   :  { %339 = vmatprep.subr.bf16.mxu0 %v494_v0  ;;  %349 = vmatprep.subr.bf16.mxu1 %v494_v0 }
  0x2e   :  { %p470_p4 = por %p469_p3, %p468_p2 }
  0x30   :  { %340 = vmatpush3.bf16.msra.mxu0 %v377_v4  ;;  %350 = vmatpush3.bf16.msra.mxu1 %v381_v8  ;;  %p471_p5 = pnand %p470_p4, %p464_p1 }
  0x31   :  { %351 = vmatprep.subr.bf16.mxu1 %v494_v0 }
  0x33   :  { %342 = vmatmul.mubr.msk.bf16.vlgmr.msra.gmra.mxu0 %vm97_vm2, %v378_v5 }
  0x34   :  { %352 = vmatpush3.bf16.msra.mxu1 %v382_v9 }
  0x35   :  { %353 = vmatprep.subr.bf16.mxu1 %v494_v0 }
  0x38   :  { %354 = vmatpush3.bf16.msra.mxu1 %v383_v10 }
  0x39   :  { %355 = vmatprep.subr.bf16.mxu1 %v494_v0 }
  0x3c   :  { %356 = vmatpush3.bf16.msra.mxu1 %v384_v11 }
  0x3d   :  { %357 = vmatprep.subr.bf16.mxu1 %v494_v0 }
  0x40   :  { %358 = vmatpush3.bf16.msra.mxu1 %v385_v12 }
  0x41   :  { %359 = vmatprep.subr.bf16.mxu1 %v494_v0 }
  0x44   :  { %360 = vmatpush3.bf16.msra.mxu1 %v386_v13 }
  0xf3   :  { %v139_v15 = vpop.f32.mrf.mxu0 }
  0xf4   :  { %v140_v16 = vadd.f32 %v303_v14, %v139_v15 }
  0xf5   :  { %v343_v17 = vpop.f32.mrf.mxu0 }
  0xf6   :  { %v309_v18 = vmul.f32 -1.442695, %v140_v16 }
  0xf7   :  { %v142_v19 = vpop.f32.mrf.mxu0 }
  0xf8   :  { %387 = vpow2.f32 %v309_v18  ;;  %v143_v20 = vadd.f32 %v303_v14, %v142_v19 }
  0xf9   :  { %v344_v21 = vpop.f32.mrf.mxu0 }
  0xfa   :  { %v310_v22 = vmul.f32 -1.442695, %v143_v20 }
  0xfc   :  { %389 = vpow2.f32 %v310_v22 }
 0x105   :  { %v388_v23 = vpop.eup %387 }
 0x106   :  { %v152_v24 = vadd.f32 1.0, %v388_v23 }
 0x108   :  { %391 = vrcp.f32 %v152_v24 }
 0x109   :  { %v390_v25 = vpop.eup %389 }
 0x10a   :  { %v153_v26 = vadd.f32 1.0, %v390_v25 }
 0x10c   :  { %393 = vrcp.f32 %v153_v26 }
 0x115   :  { %v392_v27 = vpop.eup %391 }
 0x119   :  { %v394_v28 = vpop.eup %393 }
 0x11a   :  { %v158_v29 = vpack.c.bf16 %v394_v28, %v392_v27 }
 0x11c   :  { %362 = vmatmul.mubr.bf16.vlgmr.msra.gmra.mxu1 %v158_v29 }
 0x1dc   :  { %v264_v31 = vpop.f32.mrf.mxu1 }
 0x1dd   :  { %v265_v32 = vadd.f32 %v311_v30, %v264_v31 }
 0x1de   :  { %v363_v33 = vpop.f32.mrf.mxu1 }
 0x1df   :  { %v320_v34 = vmul.f32 -1.442695, %v265_v32 }
 0x1e0   :  { %v267_v35 = vpop.f32.mrf.mxu1 }
 0x1e1   :  { %395 = vpow2.f32 %v320_v34  ;;  %v268_v36 = vadd.f32 %v311_v30, %v267_v35 }
 0x1e2   :  { %v364_v37 = vpop.f32.mrf.mxu1 }
 0x1e3   :  { %v321_v38 = vmul.f32 -1.442695, %v268_v36 }
 0x1e5   :  { %397 = vpow2.f32 %v321_v38 }
 0x1ee   :  { %v396_v39 = vpop.eup %395 }
 0x1ef   :  { %v277_v40 = vadd.f32 1.0, %v396_v39 }
 0x1f1   :  { %399 = vrcp.f32 %v277_v40 }
 0x1f2   :  { %v398_v41 = vpop.eup %397 }
 0x1f3   :  { %v278_v42 = vadd.f32 1.0, %v398_v41 }
 0x1f5   :  { %401 = vrcp.f32 %v278_v42 }
 0x1fe   :  { %v400_v43 = vpop.eup %399 }
 0x1ff   :  { %283 = vst [vmem:[#allocation8] sm:$0xff] %v400_v43 }
 0x202   :  { %v402_v44 = vpop.eup %401 }
 0x203   :  { %284 = vst [vmem:[#allocation8 + $0x8] sm:$0xff] %v402_v44 }
 0x204   :  { %474 = shalt.err (!%p471_p5)
}
 0x205   :  { %s497_s12 = smov 128   ;;  %s498_s13 = smov 8  }
 0x206   :  { %296 = dma.vmem_to_hbm [thread:$0]  %s291_s11, 256, %s552_s5, [#allocation4], %s497_s12, %s497_s12, %s498_s13  }
 0x207   :  { %487 = dma.done.wait [#allocation4], 256  }
 0x208   :  { %488 = vsyncadd [#allocation4], 4294967040 }
 0x209   :  { %300 = vsyncpa [#allocation3], 1 }
 0x20a   :  { %301 = vsyncpa [#allocation6], 1 }
 0x20b   :  { %302 = vsyncpa [#allocation4], 1 }

</bundles_post_ra>
